<compile_context>
chip_gen: v5e
topology: v5e:2x2
jax: 0.10.0
libtpu: 0.0.40
codegen_flags: <defaults>
</compile_context>

<pallas_src>
import jax
import jax.numpy as jnp
from jax.experimental import pallas as pl
from jax.experimental.pallas import tpu as pltpu

HIDDEN = 64
_LANE = 128
_SUBLANE = 8


def _round_up(x, m):
    return ((x + m - 1) // m) * m


def _padded_bytes(rows, cols, itemsize):
    """VMEM bytes of a 2-D tile after (8, 128) tiling/padding."""
    return _round_up(max(rows, 1), _SUBLANE) * _round_up(max(cols, 1), _LANE) * itemsize


def _vmem_capacity_bytes():
    try:
        return int(pltpu.get_tpu_info().vmem_capacity_bytes)
    except Exception:
        return 64 * 1024 * 1024          # conservative (v7x per-TC) fallback


def _choose_tb(B, state_dim, in_itemsize, vmem_budget):
    """Largest lane-aligned batch tile whose pipelined footprint fits the budget."""
    # Resident weights (BlockSpec inputs are double-buffered even with a
    # constant index map); biases / w3 stay f32.
    weight_bytes = 2 * (
        _padded_bytes(state_dim, HIDDEN, in_itemsize)      # w1
        + _padded_bytes(1, HIDDEN, 4)                      # b1
        + _padded_bytes(HIDDEN, HIDDEN, in_itemsize)       # w2
        + _padded_bytes(1, HIDDEN, 4)                      # b2
        + _padded_bytes(1, HIDDEN, 4))                     # w3 row (f32)
    # Per batch-row bytes: double-buffered lane-padded input tile, the
    # double-buffered f32 output row, and lane-padded f32 live intermediates
    # (x upcast, h1, h2, h2^T) with some spill headroom.
    per_row = (2 * _round_up(state_dim, _LANE) * in_itemsize
               + 2 * 4
               + 4 * _LANE * 4)
    tb = (vmem_budget - weight_bytes) // max(per_row, 1)
    tb = (tb // _LANE) * _LANE
    tb = max(_LANE, min(1024, tb))                 # plateau is 512-1024; 2048 buys nothing
    tb = min(tb, _round_up(B, _LANE))              # never pad past one lane-aligned tile
    if B >= 2 * _LANE:                             # >= 2 grid steps -> something to shard
        tb = min(tb, _round_up((B + 1) // 2, _LANE))
    return max(_LANE, tb)


def _critic_kernel(x_ref, w1_ref, b1_ref, w2_ref, b2_ref, w3_ref, b3_ref, o_ref):
    x = x_ref[...]                                                   # (TB, S)

    # Layer 1: MXU matmul with f32 accumulation; bias add + ReLU in f32 on VPU.
    h1 = jnp.dot(x, w1_ref[...], preferred_element_type=jnp.float32) + b1_ref[...]
    h1 = jnp.maximum(h1, 0.0)

    # Layer 2.
    h2 = jnp.dot(h1.astype(w2_ref.dtype), w2_ref[...],
                 preferred_element_type=jnp.float32) + b2_ref[...]
    h2 = jnp.maximum(h2, 0.0)                                        # (TB, 64) f32

    # Layer 3 (64 -> 1): one MXU pass producing a lane-dense (1, TB) value row:
    #   (1, 64) @ (64, TB).  The h2 transpose uses the XLU (slack here); the
    #   result needs no column->row relayout and is stored with TB/128 unmasked
    #   full-width vst's instead of TB/8 masked vst.msk partial stores.
    v = jnp.dot(w3_ref[...], h2.T, preferred_element_type=jnp.float32)   # (1, TB)
    o_ref[...] = (v + b3_ref[0]).astype(o_ref.dtype)


def critic_forward(state, params, *, tb=None, use_core_parallel=False, state_buffers=2):
    """state: (B, state_dim) float32 or bfloat16 -> (B, 1) float32 critic values.

    use_core_parallel: set True on v7x to shard the batch grid axis across the
    two TensorCores (CORE_PARALLEL).  state_buffers=3 deepens the input
    pipeline (useful on v5e's lower HBM bandwidth).
    """
    w1, b1, w2, b2, w3, b3 = params
    B, state_dim = state.shape

    # Compute dtype follows the state buffer; no state cast here (that would be
    # an extra HBM pass).  Only w1/w2 (tiny) are cast to match.
    compute_dtype = state.dtype
    w1c = w1 if w1.dtype == compute_dtype else w1.astype(compute_dtype)
    w2c = w2 if w2.dtype == compute_dtype else w2.astype(compute_dtype)
    b1f = b1.astype(jnp.float32).reshape(1, HIDDEN)
    b2f = b2.astype(jnp.float32).reshape(1, HIDDEN)
    w3_row = w3.astype(jnp.float32).reshape(1, HIDDEN)    # (64,1) -> (1,64), f32
    b3_s = b3.astype(jnp.float32).reshape(1)               # scalar -> SMEM

    in_itemsize = jnp.dtype(compute_dtype).itemsize
    vmem_cap = _vmem_capacity_bytes()
    vmem_limit = max(32 * 1024 * 1024, min(vmem_cap // 2, 96 * 1024 * 1024))

    if tb is None:
        TB = _choose_tb(B, state_dim, in_itemsize, vmem_limit * 3 // 4)
    else:
        TB = max(_LANE, _round_up(int(tb), _LANE))
    grid_n = -(-B // TB)
    PB = grid_n * TB

    # Streamed state tile; optionally deepen the pipeline (v5e).
    if state_buffers != 2:
        state_spec = pl.BlockSpec((TB, state_dim), lambda i: (i, 0),
                                  pipeline_mode=pl.Buffered(state_buffers))
    else:
        state_spec = pl.BlockSpec((TB, state_dim), lambda i: (i, 0))

    const_full = lambda a: pl.BlockSpec(a.shape, lambda i: (0, 0))

    weight_hbm_bytes = sum(int(a.size) * a.dtype.itemsize
                           for a in (w1c, b1f, w2c, b2f, w3_row, b3_s))
    cost = pl.CostEstimate(
        flops=2 * B * (state_dim * HIDDEN + HIDDEN * HIDDEN + HIDDEN),
        transcendentals=0,
        bytes_accessed=B * state_dim * in_itemsize + weight_hbm_bytes + PB * 4,
    )

    semantics = (pltpu.CORE_PARALLEL,) if use_core_parallel else ("parallel",)

    grid_spec = pltpu.PrefetchScalarGridSpec(
        num_scalar_prefetch=0,
        grid=(grid_n,),
        in_specs=[
            state_spec,                                        # streamed batch tiles
            const_full(w1c), const_full(b1f),                  # VMEM-resident weights
            const_full(w2c), const_full(b2f),
            const_full(w3_row),
            pl.BlockSpec(memory_space=pltpu.MemorySpace.SMEM),  # b3 scalar
        ],
        out_specs=pl.BlockSpec((1, TB), lambda i: (0, i)),     # lane-dense value row
    )

    out_row = pl.pallas_call(
        _critic_kernel,
        out_shape=jax.ShapeDtypeStruct((1, PB), jnp.float32),
        grid_spec=grid_spec,
        compiler_params=pltpu.CompilerParams(
            dimension_semantics=semantics,
            vmem_limit_bytes=vmem_limit,
        ),
        cost_estimate=cost,
    )(state, w1c, b1f, w2c, b2f, w3_row, b3_s)

    # Lane-dense slab -> (B, 1) column (cheap XLA reshape outside the kernel).
    return out_row[0, :B].reshape(B, 1)


def init_critic_params(key, state_dim):
    """PyTorch Linear default init (uniform +-1/sqrt(fan_in)); weights (in, out)."""
    ks = jax.random.split(key, 6)

    def lin(kw, kb, fan_in, fan_out):
        bound = 1.0 / jnp.sqrt(fan_in)
        w = jax.random.uniform(kw, (fan_in, fan_out), jnp.float32, -bound, bound)
        b = jax.random.uniform(kb, (1, fan_out), jnp.float32, -bound, bound)
        return w, b

    w1, b1 = lin(ks[0], ks[1], state_dim, HIDDEN)
    w2, b2 = lin(ks[2], ks[3], HIDDEN, HIDDEN)
    w3, b3 = lin(ks[4], ks[5], HIDDEN, 1)
    return (w1, b1, w2, b2, w3, b3)


def critic_reference(state, params):
    w1, b1, w2, b2, w3, b3 = params
    h1 = jnp.maximum(state @ w1 + b1, 0.0)
    h2 = jnp.maximum(h1 @ w2 + b2, 0.0)
    return h2 @ w3 + b3


if __name__ == "__main__":
    key = jax.random.PRNGKey(0)
    k_param, k_s1, k_s2, k_s3 = jax.random.split(key, 4)

    state_dim = 16
    params = init_critic_params(k_param, state_dim)

    # 1) Small batch, f32 compute, single-tile grid.
    s1 = jax.random.normal(k_s1, (8, state_dim), jnp.float32)
    o1 = jax.block_until_ready(critic_forward(s1, params))
    r1 = critic_reference(s1, params)
    assert o1.shape == (8, 1), o1.shape
    assert jnp.allclose(o1, r1, atol=1e-4, rtol=1e-4), (o1, r1)

    # 2) Multi-tile grid (batch not a multiple of the tile): TB=128 -> 2 steps;
    #    padded rows of the last tile only feed output lanes that get sliced off.
    s2 = jax.random.normal(k_s2, (200, state_dim), jnp.float32)
    o2 = jax.block_until_ready(critic_forward(s2, params, tb=128))
    r2 = critic_reference(s2, params)
    assert o2.shape == (200, 1), o2.shape
    assert jnp.allclose(o2, r2, atol=1e-4, rtol=1e-4)

    # 3) bf16 compute path: state arrives bf16 (cast belongs upstream, not in the
    #    wrapper); f32 accumulation -> loose tolerance vs. the f32 reference.
    s3 = jax.random.normal(k_s3, (64, state_dim), jnp.float32).astype(jnp.bfloat16)
    o3 = jax.block_until_ready(critic_forward(s3, params))
    r3 = critic_reference(s3.astype(jnp.float32), params)
    assert o3.shape == (64, 1), o3.shape
    assert bool(jnp.all(jnp.isfinite(o3)))
    assert jnp.allclose(o3, r3, atol=0.1, rtol=0.1)

    print("KERNEL_OK")
</pallas_src>

<mosaic_0001>
module attributes {stable_mosaic.version = 11 : i64} {
  func.func @_critic_kernel(%arg0: i32, %arg1: memref<128x16xf32, #tpu.memory_space<vmem>>, %arg2: memref<16x64xf32, #tpu.memory_space<vmem>>, %arg3: memref<1x64xf32, #tpu.memory_space<vmem>>, %arg4: memref<64x64xf32, #tpu.memory_space<vmem>>, %arg5: memref<1x64xf32, #tpu.memory_space<vmem>>, %arg6: memref<1x64xf32, #tpu.memory_space<vmem>>, %arg7: memref<1xf32, #tpu.memory_space<smem>>, %arg8: memref<1x128xf32, #tpu.memory_space<vmem>>) attributes {dimension_semantics = [#tpu.dimension_semantics<parallel>], iteration_bounds = array<i64: 1>, scalar_prefetch = 0 : i64, scratch_operands = 0 : i64, tpu.core_type = #tpu.core_type<tc>, window_params = [{transform_indices = @transform_0, window_bounds = array<i64: 128, 16>}, {pipeline_mode = #tpu.pipeline_mode<synchronous>, transform_indices = @transform_1, window_bounds = array<i64: 16, 64>}, {pipeline_mode = #tpu.pipeline_mode<synchronous>, transform_indices = @transform_2, window_bounds = array<i64: 1, 64>}, {pipeline_mode = #tpu.pipeline_mode<synchronous>, transform_indices = @transform_3, window_bounds = array<i64: 64, 64>}, {pipeline_mode = #tpu.pipeline_mode<synchronous>, transform_indices = @transform_4, window_bounds = array<i64: 1, 64>}, {pipeline_mode = #tpu.pipeline_mode<synchronous>, transform_indices = @transform_5, window_bounds = array<i64: 1, 64>}, {transform_indices = @transform_6, window_bounds = array<i64: 1>}, {transform_indices = @transform_7, window_bounds = array<i64: 1, 128>}]} {
    %c0 = arith.constant 0 : index
    %c0_0 = arith.constant 0 : index
    %0 = vector.load %arg1[%c0, %c0_0] : memref<128x16xf32, #tpu.memory_space<vmem>>, vector<128x16xf32>
    %c0_1 = arith.constant 0 : index
    %c0_2 = arith.constant 0 : index
    %1 = vector.load %arg2[%c0_1, %c0_2] : memref<16x64xf32, #tpu.memory_space<vmem>>, vector<16x64xf32>
    %cst = arith.constant dense<0.000000e+00> : vector<128x64xf32>
    %2 = tpu.matmul %0, %1, %cst {dimension_numbers = #tpu.dot_dimension_numbers<[1], [0], [0], [1], [0, 0, 1, 1], [], []>} : vector<128x16xf32>, vector<16x64xf32>, vector<128x64xf32> -> vector<128x64xf32>
    %c0_3 = arith.constant 0 : index
    %c0_4 = arith.constant 0 : index
    %3 = vector.load %arg3[%c0_3, %c0_4] : memref<1x64xf32, #tpu.memory_space<vmem>>, vector<1x64xf32>
    %4 = vector.broadcast %3 : vector<1x64xf32> to vector<128x64xf32>
    %5 = arith.addf %2, %4 : vector<128x64xf32>
    %cst_5 = arith.constant 0.000000e+00 : f32
    %6 = vector.broadcast %cst_5 : f32 to vector<128x64xf32>
    %7 = arith.maximumf %5, %6 : vector<128x64xf32>
    %c0_6 = arith.constant 0 : index
    %c0_7 = arith.constant 0 : index
    %8 = vector.load %arg4[%c0_6, %c0_7] : memref<64x64xf32, #tpu.memory_space<vmem>>, vector<64x64xf32>
    %cst_8 = arith.constant dense<0.000000e+00> : vector<128x64xf32>
    %9 = tpu.matmul %7, %8, %cst_8 {dimension_numbers = #tpu.dot_dimension_numbers<[1], [0], [0], [1], [0, 0, 1, 1], [], []>} : vector<128x64xf32>, vector<64x64xf32>, vector<128x64xf32> -> vector<128x64xf32>
    %c0_9 = arith.constant 0 : index
    %c0_10 = arith.constant 0 : index
    %10 = vector.load %arg5[%c0_9, %c0_10] : memref<1x64xf32, #tpu.memory_space<vmem>>, vector<1x64xf32>
    %11 = vector.broadcast %10 : vector<1x64xf32> to vector<128x64xf32>
    %12 = arith.addf %9, %11 : vector<128x64xf32>
    %cst_11 = arith.constant 0.000000e+00 : f32
    %13 = vector.broadcast %cst_11 : f32 to vector<128x64xf32>
    %14 = arith.maximumf %12, %13 : vector<128x64xf32>
    %c0_12 = arith.constant 0 : index
    %c0_13 = arith.constant 0 : index
    %15 = vector.load %arg6[%c0_12, %c0_13] : memref<1x64xf32, #tpu.memory_space<vmem>>, vector<1x64xf32>
    %16 = tpu.transpose %14, [1, 0] : vector<128x64xf32> -> vector<64x128xf32>
    %cst_14 = arith.constant dense<0.000000e+00> : vector<1x128xf32>
    %17 = tpu.matmul %15, %16, %cst_14 {dimension_numbers = #tpu.dot_dimension_numbers<[1], [0], [0], [1], [0, 0, 1, 1], [], []>} : vector<1x64xf32>, vector<64x128xf32>, vector<1x128xf32> -> vector<1x128xf32>
    %c0_15 = arith.constant 0 : index
    %18 = memref.load %arg7[%c0_15] : memref<1xf32, #tpu.memory_space<smem>>
    %19 = vector.broadcast %18 : f32 to vector<1x128xf32>
    %20 = arith.addf %17, %19 : vector<1x128xf32>
    %c0_16 = arith.constant 0 : index
    %c0_17 = arith.constant 0 : index
    %21 = vector.load %arg8[%c0_16, %c0_17] : memref<1x128xf32, #tpu.memory_space<vmem>>, vector<1x128xf32>
    tpu.vector_store %arg8[%c0_16, %c0_17], %20 {strides = array<i32>} : memref<1x128xf32, #tpu.memory_space<vmem>>, vector<1x128xf32>,
    return
  }
  func.func @transform_0(%arg0: i32) -> (i32, i32) {
    %c0_i32 = arith.constant 0 : i32
    %c0_i32_0 = arith.constant 0 : i32
    return %arg0, %c0_i32 : i32, i32
  }
  func.func @transform_1(%arg0: i32) -> (i32, i32) {
    %c0_i32 = arith.constant 0 : i32
    %c0_i32_0 = arith.constant 0 : i32
    %c0_i32_1 = arith.constant 0 : i32
    return %c0_i32, %c0_i32_0 : i32, i32
  }
  func.func @transform_2(%arg0: i32) -> (i32, i32) {
    %c0_i32 = arith.constant 0 : i32
    %c0_i32_0 = arith.constant 0 : i32
    %c0_i32_1 = arith.constant 0 : i32
    return %c0_i32, %c0_i32_0 : i32, i32
  }
  func.func @transform_3(%arg0: i32) -> (i32, i32) {
    %c0_i32 = arith.constant 0 : i32
    %c0_i32_0 = arith.constant 0 : i32
    %c0_i32_1 = arith.constant 0 : i32
    return %c0_i32, %c0_i32_0 : i32, i32
  }
  func.func @transform_4(%arg0: i32) -> (i32, i32) {
    %c0_i32 = arith.constant 0 : i32
    %c0_i32_0 = arith.constant 0 : i32
    %c0_i32_1 = arith.constant 0 : i32
    return %c0_i32, %c0_i32_0 : i32, i32
  }
  func.func @transform_5(%arg0: i32) -> (i32, i32) {
    %c0_i32 = arith.constant 0 : i32
    %c0_i32_0 = arith.constant 0 : i32
    %c0_i32_1 = arith.constant 0 : i32
    return %c0_i32, %c0_i32_0 : i32, i32
  }
  func.func @transform_6(%arg0: i32) -> i32 {
    %c0_i32 = arith.constant 0 : i32
    %c0_i32_0 = arith.constant 0 : i32
    return %c0_i32 : i32
  }
  func.func @transform_7(%arg0: i32) -> (i32, i32) {
    %c0_i32 = arith.constant 0 : i32
    %c0_i32_0 = arith.constant 0 : i32
    return %c0_i32, %arg0 : i32, i32
  }
}

</mosaic_0001>

<bundles_post_ra>
// kernel: tpu_custom_call.1
= control target key start
LH: loop header
LB: loop body
LE: loop exit
PB: predicated region body
PF: predicated region fallthrough
CT: control target
= control target key end

     0   :  { %13 = vsyncpa [#allocation4], 0  ;;  %s768_s0 = inlined_call_operand.hbm [shape: f32[8,16], index: 0, kind: input, shape index: {}]   ;;  %s769_s1 = inlined_call_operand.hbm [shape: f32[16,64], index: 1, kind: input, shape index: {}]   ;;  %s770_s2 = inlined_call_operand.vmem [shape: f32[1,64], index: 2, kind: input, shape index: {}]   ;;  %s771_s3 = inlined_call_operand.hbm [shape: f32[64,64], index: 3, kind: input, shape index: {}]   ;;  %s772_s4 = inlined_call_operand.vmem [shape: f32[1,64], index: 4, kind: input, shape index: {}]   ;;  %s773_s5 = inlined_call_operand.vmem [shape: f32[1,64], index: 5, kind: input, shape index: {}]   ;;  %s774_s6 = inlined_call_operand.<no memory space> [shape: f32[1], index: 6, kind: input, shape index: {}]   ;;  %s775_s7 = inlined_call_operand.hbm [shape: f32[1,128], index: 7, kind: output, shape index: {}]  }
   0x1   :  { %14 = vsyncpa [#allocation7], 0 }
   0x2   :  { %15 = vsyncpa [#allocation5], 0 }
   0x3   :  { %19 = vsyncadd [#allocation4], 1920  ;;  %s33_s26 = sshll.u32 %s769_s1, 4  ;;  %s631_s27 = smov [#allocation6]   ;;  %s34_s26 = int_to_ptr.hbm [resolvable:$true] %s33_s26 }
   0x4   :  { %s35_s28 = sshll.u32 %s631_s27, 4  ;;  %s20_s8 = sshll.u32 %s768_s0, 4  ;;  %s36_s28 = int_to_ptr.vmem [resolvable:$true] %s35_s28  ;;  %s21_s8 = int_to_ptr.hbm [resolvable:$true] %s20_s8 }
   0x5   :  { %s632_s9 = smov 128   ;;  %s633_s10 = smov 8  }
   0x6   :  { %41 = dma.hbm_to_vmem [thread:$0]  %s34_s26, 256, %s36_s28, [#allocation7], %s632_s9, %s632_s9, %s633_s10  }
   0x7   :  { %s634_s11 = smov [#allocation3]   ;;  %s48_s15 = sshll.u32 %s771_s3, 4  ;;  %s49_s15 = int_to_ptr.hbm [resolvable:$true] %s48_s15 }
   0x8   :  { %s22_s12 = sshll.u32 %s634_s11, 4  ;;  %s635_s1 = smov [#allocation8]   ;;  %s23_s12 = int_to_ptr.vmem [resolvable:$true] %s22_s12 }
   0x9   :  { %28 = dma.hbm_to_vmem [thread:$0]  %s21_s8, 128, %s23_s12, [#allocation4], %s632_s9, %s632_s9, %s633_s10  }
   0xa   :  { %s50_s16 = sshll.u32 %s635_s1, 4  ;;  %s51_s16 = int_to_ptr.vmem [resolvable:$true] %s50_s16 }
   0xb   :  { %56 = dma.hbm_to_vmem [thread:$0]  %s49_s15, 1024, %s51_s16, [#allocation7], %s632_s9, %s632_s9, %s633_s10  }
   0xc   :  { %625 = dma.done.wait [#allocation4], 2048  }
   0xd   :  { %626 = vsyncadd [#allocation4], 4294965248 }
   0xe   :  { %627 = dma.done.wait [#allocation7], 1280  }
   0xf   :  { %628 = vsyncadd [#allocation7], 4294966016  ;;  %v92_v0 = vld [vmem:[#allocation6 + $0x8] sm:$0xff]  ;;  %v91_v1 = vld [vmem:[#allocation6] sm:$0xff]  ;;  %vm97_vm0 = vcmask 130048   ;;  %vm239_vm1 = vcmask 523264  }
  0x10   :  { %160 = vmatpush.msra.mxu0 %v92_v0  ;;  %v75_v2 = vld [vmem:[#allocation3] sm:$0xff]  ;;  %511 = vmatpush.msra.mxu3 %v92_v0  ;;  %v76_v3 = vld [vmem:[#allocation3 + $0x8] sm:$0xff]  ;;  %v77_v4 = vld [vmem:[#allocation3 + $0x10] sm:$0xff]  ;;  %s636_s21 = smov [#allocation9]   ;;  %s451_s25 = sshll.u32 %s775_s7, 4  ;;  %s452_s25 = int_to_ptr.hbm [resolvable:$true] %s451_s25 }
  0x11   :  { %v78_v5 = vld [vmem:[#allocation3 + $0x18] sm:$0xff]  ;;  %v79_v6 = vld [vmem:[#allocation3 + $0x20] sm:$0xff]  ;;  %v80_v7 = vld [vmem:[#allocation3 + $0x28] sm:$0xff]  ;;  %s449_s22 = sshll.u32 %s636_s21, 4  ;;  %s450_s22 = int_to_ptr.vmem [resolvable:$true] %s449_s22 }
  0x12   :  { %161 = vmatpush.msra.mxu0 %v91_v1  ;;  %512 = vmatpush.msra.mxu3 %v91_v1  ;;  %v81_v8 = vld [vmem:[#allocation3 + $0x30] sm:$0xff]  ;;  %v86_v9 = vld [vmem:[#allocation3 + $0x58] sm:$0xff]  ;;  %v234_v10 = vld [vmem:[#allocation8 + $0x38] sm:$0xff] }
  0x13   :  { %462 = vmatmul.msk.f32.vlgmr.msra.gmra.mxu0 %vm97_vm0, %v75_v2  ;;  %473 = vmatmul.msk.f32.vlgmr.msra.gmra.mxu3 %vm97_vm0, %v86_v9  ;;  %v233_v11 = vld [vmem:[#allocation8 + $0x30] sm:$0xff]  ;;  %v232_v12 = vld [vmem:[#allocation8 + $0x28] sm:$0xff]  ;;  %v231_v14 = vld [vmem:[#allocation8 + $0x20] sm:$0xff] }
  0x14   :  { %296 = vmatpush.msra.mxu1 %v234_v10  ;;  %513 = vmatpush.msrb.mxu3 %v234_v10  ;;  %v82_v13 = vld [vmem:[#allocation3 + $0x38] sm:$0xff]  ;;  %v87_v15 = vld [vmem:[#allocation3 + $0x60] sm:$0xff]  ;;  %v230_v16 = vld [vmem:[#allocation8 + $0x18] sm:$0xff] }
  0x15   :  { %v83_v17 = vld [vmem:[#allocation3 + $0x40] sm:$0xff]  ;;  %v88_v18 = vld [vmem:[#allocation3 + $0x68] sm:$0xff]  ;;  %v89_v20 = vld [vmem:[#allocation3 + $0x70] sm:$0xff] }
  0x16   :  { %297 = vmatpush.msra.mxu1 %v233_v11  ;;  %514 = vmatpush.msrb.mxu3 %v233_v11  ;;  %v84_v19 = vld [vmem:[#allocation3 + $0x48] sm:$0xff]  ;;  %v85_v21 = vld [vmem:[#allocation3 + $0x50] sm:$0xff]  ;;  %v90_v22 = vld [vmem:[#allocation3 + $0x78] sm:$0xff] }
  0x17   :  { %v229_v23 = vld [vmem:[#allocation8 + $0x10] sm:$0xff]  ;;  %v228_v24 = vld [vmem:[#allocation8 + $0x8] sm:$0xff]  ;;  %v227_v25 = vld [vmem:[#allocation8] sm:$0xff] }
  0x18   :  { %298 = vmatpush.msra.mxu1 %v232_v12  ;;  %515 = vmatpush.msrb.mxu3 %v232_v12  ;;  %v705_v26 = vld [vmem:[%s770_s2] ss:$0 sm:$0xff] }
  0x1a   :  { %299 = vmatpush.msra.mxu1 %v231_v14  ;;  %516 = vmatpush.msrb.mxu3 %v231_v14 }
  0x1b   :  { %463 = vmatmul.msk.f32.gmra.mxu0 %vm97_vm0, %v76_v3  ;;  %474 = vmatmul.msk.f32.gmra.mxu3 %vm97_vm0, %v87_v15 }
  0x1c   :  { %300 = vmatpush.msra.mxu1 %v230_v16  ;;  %517 = vmatpush.msrb.mxu3 %v230_v16 }
  0x1e   :  { %301 = vmatpush.msra.mxu1 %v229_v23  ;;  %518 = vmatpush.msrb.mxu3 %v229_v23  ;;  %v528_v23 = vld [vmem:[%s772_s4] ss:$0 sm:$0xff] }
  0x20   :  { %302 = vmatpush.msra.mxu1 %v228_v24  ;;  %519 = vmatpush.msrb.mxu3 %v228_v24 }
  0x22   :  { %303 = vmatpush.msra.mxu1 %v227_v25  ;;  %520 = vmatpush.msrb.mxu3 %v227_v25 }
  0x23   :  { %464 = vmatmul.msk.f32.gmra.mxu0 %vm97_vm0, %v77_v4  ;;  %475 = vmatmul.msk.f32.gmra.mxu3 %vm97_vm0, %v88_v18 }
  0x2b   :  { %465 = vmatmul.msk.f32.gmra.mxu0 %vm97_vm0, %v78_v5  ;;  %476 = vmatmul.msk.f32.gmra.mxu3 %vm97_vm0, %v89_v20 }
  0x33   :  { %466 = vmatmul.msk.f32.gmra.mxu0 %vm97_vm0, %v79_v6  ;;  %477 = vmatmul.msk.f32.gmra.mxu3 %vm97_vm0, %v90_v22 }
  0x3b   :  { %467 = vmatmul.msk.f32.gmra.mxu0 %vm97_vm0, %v80_v7 }
  0x43   :  { %468 = vmatmul.msk.f32.gmra.mxu0 %vm97_vm0, %v81_v8 }
  0x4b   :  { %469 = vmatmul.msk.f32.gmra.mxu0 %vm97_vm0, %v82_v13 }
  0x53   :  { %470 = vmatmul.msk.f32.gmra.mxu0 %vm97_vm0, %v83_v17 }
  0x5b   :  { %471 = vmatmul.msk.f32.gmra.mxu0 %vm97_vm0, %v84_v19 }
  0x63   :  { %472 = vmatmul.msk.f32.gmra.mxu0 %vm97_vm0, %v85_v21 }
  0x90   :  { %v163_v27 = vpop.f32.mrf.mxu0 }
  0x91   :  { %v164_v28 = vadd.f32 %v705_v26, %v163_v27 }
  0x93   :  { %v211_v29 = vmax.f32 %v164_v28, 0.0 }
  0x95   :  { %478 = vmatmul.msk.f32.vlgmr.msra.gmra.mxu1 %vm239_vm1, %v211_v29 }
  0x96   :  { %v196_v56 = vpop.f32.mrf.mxu3 }
  0x97   :  { %v197_v62 = vadd.f32 %v705_v26, %v196_v56 }
  0x98   :  { %v166_v30 = vpop.f32.mrf.mxu0 }
  0x99   :  { %v167_v31 = vadd.f32 %v705_v26, %v166_v30  ;;  %v222_v63 = vmax.f32 %v197_v62, 0.0 }
  0x9b   :  { %v212_v32 = vmax.f32 %v167_v31, 0.0 }
  0x9d   :  { %479 = vmatmul.msk.f32.gmra.mxu1 %vm239_vm1, %v212_v32 }
  0x9e   :  { %v199_v61 = vpop.f32.mrf.mxu3 }
  0x9f   :  { %v200_v0 = vadd.f32 %v705_v26, %v199_v61  ;;  %v371_v61 = vstv %s774_s6 }
  0xa0   :  { %v169_v33 = vpop.f32.mrf.mxu0 }
  0xa1   :  { %v170_v34 = vadd.f32 %v705_v26, %v169_v33  ;;  %v223_v2 = vmax.f32 %v200_v0, 0.0 }
  0xa3   :  { %v213_v35 = vmax.f32 %v170_v34, 0.0 }
  0xa5   :  { %480 = vmatmul.msk.f32.gmra.mxu1 %vm239_vm1, %v213_v35 }
  0xa6   :  { %v202_v1 = vpop.f32.mrf.mxu3 }
  0xa7   :  { %v203_v3 = vadd.f32 %v705_v26, %v202_v1 }
  0xa8   :  { %v172_v36 = vpop.f32.mrf.mxu0 }
  0xa9   :  { %v173_v37 = vadd.f32 %v705_v26, %v172_v36  ;;  %v224_v5 = vmax.f32 %v203_v3, 0.0 }
  0xab   :  { %v214_v38 = vmax.f32 %v173_v37, 0.0 }
  0xad   :  { %481 = vmatmul.msk.f32.gmra.mxu1 %vm239_vm1, %v214_v38 }
  0xae   :  { %v205_v4 = vpop.f32.mrf.mxu3 }
  0xaf   :  { %v206_v6 = vadd.f32 %v705_v26, %v205_v4 }
  0xb0   :  { %v175_v39 = vpop.f32.mrf.mxu0 }
  0xb1   :  { %v176_v40 = vadd.f32 %v705_v26, %v175_v39  ;;  %v225_v7 = vmax.f32 %v206_v6, 0.0 }
  0xb3   :  { %v215_v41 = vmax.f32 %v176_v40, 0.0 }
  0xb5   :  { %482 = vmatmul.msk.f32.gmra.mxu1 %vm239_vm1, %v215_v41 }
  0xb6   :  { %v208_v8 = vpop.f32.mrf.mxu3 }
  0xb7   :  { %v209_v9 = vadd.f32 %v705_v26, %v208_v8 }
  0xb8   :  { %v178_v42 = vpop.f32.mrf.mxu0 }
  0xb9   :  { %v179_v43 = vadd.f32 %v705_v26, %v178_v42  ;;  %v226_v10 = vmax.f32 %v209_v9, 0.0 }
  0xbb   :  { %v216_v44 = vmax.f32 %v179_v43, 0.0 }
  0xbd   :  { %483 = vmatmul.msk.f32.gmra.mxu1 %vm239_vm1, %v216_v44 }
  0xc0   :  { %v181_v45 = vpop.f32.mrf.mxu0 }
  0xc1   :  { %v182_v46 = vadd.f32 %v705_v26, %v181_v45 }
  0xc3   :  { %v217_v47 = vmax.f32 %v182_v46, 0.0 }
  0xc5   :  { %484 = vmatmul.msk.f32.gmra.mxu1 %vm239_vm1, %v217_v47 }
  0xc8   :  { %v184_v48 = vpop.f32.mrf.mxu0 }
  0xc9   :  { %v185_v49 = vadd.f32 %v705_v26, %v184_v48 }
  0xcb   :  { %v218_v50 = vmax.f32 %v185_v49, 0.0 }
  0xcd   :  { %485 = vmatmul.msk.f32.gmra.mxu1 %vm239_vm1, %v218_v50 }
  0xd0   :  { %v187_v51 = vpop.f32.mrf.mxu0 }
  0xd1   :  { %v188_v52 = vadd.f32 %v705_v26, %v187_v51 }
  0xd3   :  { %v219_v53 = vmax.f32 %v188_v52, 0.0 }
  0xd5   :  { %486 = vmatmul.msk.f32.gmra.mxu1 %vm239_vm1, %v219_v53 }
  0xd8   :  { %v190_v54 = vpop.f32.mrf.mxu0 }
  0xd9   :  { %v191_v55 = vadd.f32 %v705_v26, %v190_v54 }
  0xdb   :  { %v220_v57 = vmax.f32 %v191_v55, 0.0 }
  0xdd   :  { %487 = vmatmul.msk.f32.gmra.mxu1 %vm239_vm1, %v220_v57 }
  0xe0   :  { %v193_v58 = vpop.f32.mrf.mxu0 }
  0xe1   :  { %v194_v59 = vadd.f32 %v705_v26, %v193_v58 }
  0xe3   :  { %v221_v60 = vmax.f32 %v194_v59, 0.0 }
  0xe5   :  { %488 = vmatmul.msk.f32.vlgmr.msrb.gmra.mxu3 %vm239_vm1, %v221_v60  ;;  %v369_v60 = vld [vmem:[%s773_s5] sm:$0x1] }
  0xed   :  { %489 = vmatmul.msk.f32.gmra.mxu3 %vm239_vm1, %v222_v63 }
  0xf5   :  { %490 = vmatmul.msk.f32.gmra.mxu3 %vm239_vm1, %v223_v2 }
  0xfd   :  { %491 = vmatmul.msk.f32.gmra.mxu3 %vm239_vm1, %v224_v5 }
 0x105   :  { %492 = vmatmul.msk.f32.gmra.mxu3 %vm239_vm1, %v225_v7 }
 0x10d   :  { %493 = vmatmul.msk.f32.gmra.mxu3 %vm239_vm1, %v226_v10 }
 0x112   :  { %v305_v11 = vpop.f32.mrf.mxu1 }
 0x113   :  { %v306_v57 = vadd.f32 %v528_v23, %v305_v11 }
 0x115   :  { %v353_v59 = vmax.f32 %v306_v57, 0.0 }
 0x11a   :  { %v308_v12 = vpop.f32.mrf.mxu1 }
 0x11b   :  { %v309_v55 = vadd.f32 %v528_v23, %v308_v12 }
 0x11d   :  { %v354_v58 = vmax.f32 %v309_v55, 0.0 }
 0x122   :  { %v311_v13 = vpop.f32.mrf.mxu1 }
 0x123   :  { %v312_v53 = vadd.f32 %v528_v23, %v311_v13 }
 0x125   :  { %v355_v56 = vmax.f32 %v312_v53, 0.0 }
 0x12a   :  { %v314_v14 = vpop.f32.mrf.mxu1 }
 0x12b   :  { %v315_v51 = vadd.f32 %v528_v23, %v314_v14 }
 0x12d   :  { %v356_v54 = vmax.f32 %v315_v51, 0.0 }
 0x132   :  { %v317_v17 = vpop.f32.mrf.mxu1 }
 0x133   :  { %v318_v49 = vadd.f32 %v528_v23, %v317_v17 }
 0x135   :  { %v357_v52 = vmax.f32 %v318_v49, 0.0 }
 0x13a   :  { %v320_v19 = vpop.f32.mrf.mxu1 }
 0x13b   :  { %v321_v47 = vadd.f32 %v528_v23, %v320_v19 }
 0x13d   :  { %v358_v50 = vmax.f32 %v321_v47, 0.0 }
 0x142   :  { %v323_v21 = vpop.f32.mrf.mxu1 }
 0x143   :  { %v324_v45 = vadd.f32 %v528_v23, %v323_v21 }
 0x145   :  { %v359_v48 = vmax.f32 %v324_v45, 0.0 }
 0x14a   :  { %v326_v24 = vpop.f32.mrf.mxu1 }
 0x14b   :  { %v327_v43 = vadd.f32 %v528_v23, %v326_v24 }
 0x14d   :  { %v360_v46 = vmax.f32 %v327_v43, 0.0 }
 0x152   :  { %v329_v31 = vpop.f32.mrf.mxu1 }
 0x153   :  { %v330_v41 = vadd.f32 %v528_v23, %v329_v31 }
 0x155   :  { %v361_v44 = vmax.f32 %v330_v41, 0.0 }
 0x15a   :  { %v332_v38 = vpop.f32.mrf.mxu1 }
 0x15b   :  { %v333_v39 = vadd.f32 %v528_v23, %v332_v38 }
 0x15d   :  { %v362_v42 = vmax.f32 %v333_v39, 0.0 }
 0x168   :  { %v335_v15 = vpop.f32.mrf.mxu3 }
 0x169   :  { %v336_v36 = vadd.f32 %v528_v23, %v335_v15 }
 0x16b   :  { %v363_v40 = vmax.f32 %v336_v36, 0.0 }
 0x170   :  { %v338_v16 = vpop.f32.mrf.mxu3 }
 0x171   :  { %v339_v34 = vadd.f32 %v528_v23, %v338_v16 }
 0x173   :  { %v364_v37 = vmax.f32 %v339_v34, 0.0 }
 0x178   :  { %v341_v18 = vpop.f32.mrf.mxu3 }
 0x179   :  { %v342_v32 = vadd.f32 %v528_v23, %v341_v18 }
 0x17b   :  { %v365_v35 = vmax.f32 %v342_v32, 0.0 }
 0x180   :  { %v344_v20 = vpop.f32.mrf.mxu3 }
 0x181   :  { %v345_v29 = vadd.f32 %v528_v23, %v344_v20 }
 0x183   :  { %v366_v33 = vmax.f32 %v345_v29, 0.0 }
 0x188   :  { %v347_v22 = vpop.f32.mrf.mxu3 }
 0x189   :  { %v348_v27 = vadd.f32 %v528_v23, %v347_v22 }
 0x18b   :  { %v367_v30 = vmax.f32 %v348_v27, 0.0 }
 0x190   :  { %v350_v25 = vpop.f32.mrf.mxu3 }
 0x191   :  { %v351_v26 = vadd.f32 %v528_v23, %v350_v25 }
 0x193   :  { %v368_v28 = vmax.f32 %v351_v26, 0.0 }
 0x195   :  { %494 = vmatpush.xpose.msk.msra.mxu2 %vm239_vm1, %v368_v28 }
 0x199   :  { %495 = vmatpush.xpose.msk.msra.mxu2 %vm239_vm1, %v367_v30 }
 0x19d   :  { %496 = vmatpush.xpose.msk.msra.mxu2 %vm239_vm1, %v366_v33 }
 0x1a1   :  { %497 = vmatpush.xpose.msk.msra.mxu2 %vm239_vm1, %v365_v35 }
 0x1a5   :  { %498 = vmatpush.xpose.msk.msra.mxu2 %vm239_vm1, %v364_v37 }
 0x1a9   :  { %499 = vmatpush.xpose.msk.msra.mxu2 %vm239_vm1, %v363_v40 }
 0x1ad   :  { %500 = vmatpush.xpose.msk.msra.mxu2 %vm239_vm1, %v362_v42 }
 0x1b1   :  { %501 = vmatpush.xpose.msk.msra.mxu2 %vm239_vm1, %v361_v44 }
 0x1b5   :  { %502 = vmatpush.xpose.msk.msra.mxu2 %vm239_vm1, %v360_v46 }
 0x1b9   :  { %503 = vmatpush.xpose.msk.msra.mxu2 %vm239_vm1, %v359_v48 }
 0x1bd   :  { %504 = vmatpush.xpose.msk.msra.mxu2 %vm239_vm1, %v358_v50 }
 0x1c1   :  { %505 = vmatpush.xpose.msk.msra.mxu2 %vm239_vm1, %v357_v52 }
 0x1c5   :  { %506 = vmatpush.xpose.msk.msra.mxu2 %vm239_vm1, %v356_v54 }
 0x1c9   :  { %507 = vmatpush.xpose.msk.msra.mxu2 %vm239_vm1, %v355_v56 }
 0x1cd   :  { %508 = vmatpush.xpose.msk.msra.mxu2 %vm239_vm1, %v354_v58 }
 0x1d1   :  { %509 = vmatpush.xpose.msk.msra.mxu2 %vm239_vm1, %v353_v59 }
 0x1d4   :  { %510 = vmatmul.msk.f32.vlgmr.msra.gmra.mxu2 %vm239_vm1, %v369_v60 }
 0x257   :  { %v440_v62 = vpop.f32.mrf.mxu2 }
 0x258   :  { %v441_v63 = vadd.f32 %v440_v62, %v371_v61 }
 0x25a   :  { %443 = vst [vmem:[#allocation9] sm:$0x1] %v441_v63 }
 0x25b   :  { %454 = dma.vmem_to_hbm [thread:$0]  %s450_s22, 16, %s452_s25, [#allocation5]  }
 0x25c   :  { %629 = dma.done.wait [#allocation5], 16  }
 0x25d   :  { %630 = vsyncadd [#allocation5], 4294967280 }
 0x25e   :  { %459 = vsyncpa [#allocation4], 1 }
 0x25f   :  { %460 = vsyncpa [#allocation7], 1 }
 0x260   :  { %461 = vsyncpa [#allocation5], 1 }

</bundles_post_ra>
